<compile_context>
chip_gen: v5e
topology: v5e:2x2
jax: 0.10.0
libtpu: 0.0.40
codegen_flags: <defaults>
</compile_context>

<pallas_src>
import jax
import jax.numpy as jnp
from jax.experimental import pallas as pl
from jax.experimental.pallas import tpu as pltpu

# ---------------- Module config (mirrors QuantizedLinear.__init__ args) ----------------
IN_FEATURES = 256
OUT_FEATURES = 256
TD_X = 16
TD_Y = 16
L = 16
K = 2
V = 2
TLUT_BITS = 16          # decode_mode='lut' => tlut has 2**L entries
DECODE_MODE = "lut"
USE_BIAS = True


# ---------------- Glue: Hadamard matrices and trellis decode (plain JAX) ----------------
def hadamard_matrix(n):
    h = jnp.array([[1.0]], dtype=jnp.float32)
    while h.shape[0] < n:
        h = jnp.block([[h, h], [h, -h]])
    return h


def decode_hatW(trellis_i16, tlut, out_features, in_features,
                td_x, td_y, l_bits, k_bits, v_vals, tlut_bits):
    """Bitshift-trellis LUT decode -> dense hatW (out_features, in_features), float32.

    Each trellis row packs td_x*td_y*K bits (MSB-first within each int16 word).
    Decode step t reads the L-bit state ending at circular bit position (t+1)*K*V
    and looks up V weights in tlut.
    """
    nblk, nwords = trellis_i16.shape
    bits_per_block = td_x * td_y * k_bits
    t_steps = (td_x * td_y) // v_vals
    kv = k_bits * v_vals

    words = jax.lax.bitcast_convert_type(trellis_i16, jnp.uint16).astype(jnp.uint32)
    shifts = (15 - jnp.arange(16, dtype=jnp.uint32))
    bits = (words[:, :, None] >> shifts[None, None, :]) & jnp.uint32(1)     # (nblk, nwords, 16)
    bits = bits.reshape(nblk, nwords * 16)[:, :bits_per_block]              # (nblk, bits)

    pos = (jnp.arange(t_steps)[:, None] * kv + kv - l_bits
           + jnp.arange(l_bits)[None, :]) % bits_per_block
    state_bits = bits[:, pos]                                               # (nblk, T, L)
    weights = (jnp.uint32(1) << (l_bits - 1 - jnp.arange(l_bits, dtype=jnp.uint32)))
    states = jnp.sum(state_bits * weights[None, None, :], axis=-1)          # (nblk, T)
    idx = (states & jnp.uint32((1 << tlut_bits) - 1)).astype(jnp.int32)

    vals = tlut[idx]                                                        # (nblk, T, V) f16
    hatW = vals.astype(jnp.float32).reshape(
        out_features // td_x, in_features // td_y, td_x, td_y)
    hatW = jnp.transpose(hatW, (0, 2, 1, 3)).reshape(out_features, in_features)
    return hatW


def build_fused_weight(trellis, tlut, su, sv, out_features, in_features,
                       td_x, td_y, l_bits, k_bits, v_vals, tlut_bits):
    """Offline fusion of all static operands into a single bf16 weight (in, out).

        W_fused = diag(SU) @ H_in @ hatW^T @ H_out @ diag(SV)

    so the per-token forward is just  y = x @ W_fused + bias.
    bf16 storage costs ~2 mantissa bits vs the fp16 hatW values; if that ever
    regresses accuracy for a deployment, returning w.astype(jnp.float32) is a
    drop-in (kernel casts whatever it gets to bf16 at the MXU input).
    """
    hatW = decode_hatW(trellis, tlut, out_features, in_features,
                       td_x, td_y, l_bits, k_bits, v_vals, tlut_bits)
    hin = hadamard_matrix(in_features) / jnp.sqrt(jnp.float32(in_features))
    hout = hadamard_matrix(out_features) / jnp.sqrt(jnp.float32(out_features))
    w = (su.astype(jnp.float32)[:, None] * hin)                             # diag(SU) @ H_in
    w = w @ hatW.T                                                          # @ hatW^T
    w = w @ hout                                                            # @ H_out
    w = w * sv.astype(jnp.float32)[None, :]                                 # @ diag(SV)
    return w.astype(jnp.bfloat16)


# ---------------- Pallas kernel: single-GEMM hot path ----------------
def qlinear_kernel(x_ref, w_ref, b_ref, o_ref):
    # x_ref: (bm, in)  activation row tile (bf16 passes through; f32 is cast here)
    # w_ref: (in, out) fused bf16 weight, resident across the grid (constant index_map)
    # b_ref: (1, out)  f32 bias
    # o_ref: (bm, out) output tile (same dtype as x)
    x = x_ref[...].astype(jnp.bfloat16)
    y = jnp.dot(x, w_ref[...], preferred_element_type=jnp.float32)          # bf16 MXU, f32 accum
    o_ref[...] = (y + b_ref[...]).astype(o_ref.dtype)                       # f32 epilogue


def _round_up(x, m):
    return (x + m - 1) // m * m


@jax.jit
def quantized_linear_forward(x, w_fused, bias):
    """y = x @ w_fused + bias, tiled over flattened batch rows (no pad/slice copies)."""
    lead = x.shape[:-1]
    m = x.shape[-1]
    n = w_fused.shape[-1]
    x2 = x.reshape(-1, m)
    rows = x2.shape[0]

    # Row-tile selection (static under jit):
    #   * >=128 and a multiple of 128 (MXU-friendly, bf16-sublane multiple)
    #   * capped at 512: measured ~85% of HBM roofline at 512 vs ~30% at 128
    #   * split so grid_m >= 2 when rows allow it, so the "parallel" grid axis can
    #     be sharded over both v7x TensorCores (v5e/v6e single-TC: no effect).
    # At this cap per-step VMEM (double-buffered f32 x + out + resident bf16 W)
    # stays ~2.3 MiB, far under the v7x 32 MiB scoped / 64 MiB physical limits,
    # so no vmem_limit_bytes override is needed; revisit if the cap is raised >=2048.
    if rows <= 128:
        block_rows = 128
    else:
        block_rows = min(512, _round_up(pl.cdiv(rows, 2), 128))
    grid_m = pl.cdiv(rows, block_rows)

    x_bytes = jnp.dtype(x.dtype).itemsize
    cost = pl.CostEstimate(
        flops=2 * rows * m * n,
        transcendentals=0,
        bytes_accessed=rows * m * x_bytes                       # x
        + m * n * jnp.dtype(w_fused.dtype).itemsize             # W_fused
        + n * jnp.dtype(bias.dtype).itemsize                    # bias
        + rows * n * x_bytes,                                   # y
    )

    out = pl.pallas_call(
        qlinear_kernel,
        out_shape=jax.ShapeDtypeStruct((rows, n), x.dtype),
        grid_spec=pltpu.PrefetchScalarGridSpec(
            num_scalar_prefetch=0,
            grid=(grid_m,),
            in_specs=[
                pl.BlockSpec((block_rows, m), lambda i: (i, 0)),   # x rows (streamed; ragged
                                                                   # last block is masked)
                pl.BlockSpec((m, n), lambda i: (0, 0)),            # fused bf16 weight (resident)
                pl.BlockSpec((1, n), lambda i: (0, 0)),            # bias (resident)
            ],
            out_specs=pl.BlockSpec((block_rows, n), lambda i: (i, 0)),
        ),
        # Parallel grid axis lets Mosaic shard row tiles across both v7x TensorCores.
        compiler_params=pltpu.CompilerParams(dimension_semantics=("parallel",)),
        cost_estimate=cost,
    )(x2, w_fused, bias)

    return out.reshape(*lead, n)


if __name__ == "__main__":
    key = jax.random.PRNGKey(0)
    k1, k2, k3, k4, k5 = jax.random.split(key, 5)

    # Deterministic synthetic "weights" with the shapes from __init__.
    nblk = (OUT_FEATURES // TD_X) * (IN_FEATURES // TD_Y)
    nwords = (TD_X * TD_Y * K + 15) // 16
    trellis = jax.random.randint(k1, (nblk, nwords), minval=-32768, maxval=32768,
                                 dtype=jnp.int32).astype(jnp.int16)
    tlut = (0.05 * jax.random.normal(k2, (2 ** TLUT_BITS, V))).astype(jnp.float16)
    SU = jnp.sign(jax.random.normal(k3, (IN_FEATURES,))).astype(jnp.float16)   # module dtype fp16
    SV = jax.random.normal(k4, (OUT_FEATURES,), dtype=jnp.float32)
    bias = jnp.ones((OUT_FEATURES,), dtype=jnp.float32)

    # Parameter setup (one-time glue): decode quantized weight and fuse
    # Hadamards + SU/SV scales into a single bf16 matrix.
    w_fused = build_fused_weight(trellis, tlut, SU, SV, OUT_FEATURES, IN_FEATURES,
                                 TD_X, TD_Y, L, K, V, TLUT_BITS)

    # 192 flattened rows: block_rows=128, grid_m=2 (both v7x TCs get a tile) and
    # the second tile is ragged (rows 128..191) — exercises the masked-write path
    # that replaced wrapper-side padding.
    x = jax.random.normal(k5, (2, 96, IN_FEATURES), dtype=jnp.float32)

    out = quantized_linear_forward(x, w_fused, bias[None, :])
    out = jax.block_until_ready(out)

    # Pure-JAX f32 reference of the ORIGINAL (un-fused) math; tolerance covers
    # bf16 fused-weight/activation storage + MXU rounding (the original QTIP path
    # accumulates in fp16, so f32-accum here is at least as accurate in spirit).
    hatW = decode_hatW(trellis, tlut, OUT_FEATURES, IN_FEATURES,
                       TD_X, TD_Y, L, K, V, TLUT_BITS)
    hin = hadamard_matrix(IN_FEATURES) / jnp.sqrt(jnp.float32(IN_FEATURES))
    hout = hadamard_matrix(OUT_FEATURES) / jnp.sqrt(jnp.float32(OUT_FEATURES))
    x2 = x.reshape(-1, IN_FEATURES) * SU.astype(jnp.float32)
    ref = ((x2 @ hin) @ hatW.T) @ hout
    ref = (ref * SV + bias).reshape(2, 96, OUT_FEATURES)
    rel = float(jnp.max(jnp.abs(out - ref)) / (jnp.max(jnp.abs(ref)) + 1e-6))
    assert rel < 5e-2, f"kernel/reference mismatch, rel err {rel}"

    print("KERNEL_OK")
</pallas_src>

<mosaic_0001>
module attributes {stable_mosaic.version = 11 : i64} {
  func.func @qlinear_kernel(%arg0: i32, %arg1: memref<128x256xf32, #tpu.memory_space<vmem>>, %arg2: memref<256x256xbf16, #tpu.memory_space<vmem>>, %arg3: memref<1x256xf32, #tpu.memory_space<vmem>>, %arg4: memref<128x256xf32, #tpu.memory_space<vmem>>) attributes {dimension_semantics = [#tpu.dimension_semantics<parallel>], iteration_bounds = array<i64: 2>, scalar_prefetch = 0 : i64, scratch_operands = 0 : i64, tpu.core_type = #tpu.core_type<tc>, window_params = [{transform_indices = @transform_0, window_bounds = array<i64: 128, 256>}, {pipeline_mode = #tpu.pipeline_mode<synchronous>, transform_indices = @transform_1, window_bounds = array<i64: 256, 256>}, {pipeline_mode = #tpu.pipeline_mode<synchronous>, transform_indices = @transform_2, window_bounds = array<i64: 1, 256>}, {transform_indices = @transform_3, window_bounds = array<i64: 128, 256>}]} {
    %c0 = arith.constant 0 : index
    %c0_0 = arith.constant 0 : index
    %0 = vector.load %arg1[%c0, %c0_0] : memref<128x256xf32, #tpu.memory_space<vmem>>, vector<128x256xf32>
    %1 = arith.truncf %0 : vector<128x256xf32> to vector<128x256xbf16>
    %c0_1 = arith.constant 0 : index
    %c0_2 = arith.constant 0 : index
    %2 = vector.load %arg2[%c0_1, %c0_2] : memref<256x256xbf16, #tpu.memory_space<vmem>>, vector<256x256xbf16>
    %cst = arith.constant dense<0.000000e+00> : vector<128x256xf32>
    %3 = tpu.matmul %1, %2, %cst {dimension_numbers = #tpu.dot_dimension_numbers<[1], [0], [0], [1], [0, 0, 1, 1], [], []>} : vector<128x256xbf16>, vector<256x256xbf16>, vector<128x256xf32> -> vector<128x256xf32>
    %c0_3 = arith.constant 0 : index
    %c0_4 = arith.constant 0 : index
    %4 = vector.load %arg3[%c0_3, %c0_4] : memref<1x256xf32, #tpu.memory_space<vmem>>, vector<1x256xf32>
    %5 = vector.broadcast %4 : vector<1x256xf32> to vector<128x256xf32>
    %6 = arith.addf %3, %5 : vector<128x256xf32>
    %c0_5 = arith.constant 0 : index
    %c0_6 = arith.constant 0 : index
    %7 = vector.load %arg4[%c0_5, %c0_6] : memref<128x256xf32, #tpu.memory_space<vmem>>, vector<128x256xf32>
    tpu.vector_store %arg4[%c0_5, %c0_6], %6 {strides = array<i32>} : memref<128x256xf32, #tpu.memory_space<vmem>>, vector<128x256xf32>,
    return
  }
  func.func @transform_0(%arg0: i32) -> (i32, i32) {
    %c0_i32 = arith.constant 0 : i32
    %c0_i32_0 = arith.constant 0 : i32
    return %arg0, %c0_i32 : i32, i32
  }
  func.func @transform_1(%arg0: i32) -> (i32, i32) {
    %c0_i32 = arith.constant 0 : i32
    %c0_i32_0 = arith.constant 0 : i32
    %c0_i32_1 = arith.constant 0 : i32
    return %c0_i32, %c0_i32_0 : i32, i32
  }
  func.func @transform_2(%arg0: i32) -> (i32, i32) {
    %c0_i32 = arith.constant 0 : i32
    %c0_i32_0 = arith.constant 0 : i32
    %c0_i32_1 = arith.constant 0 : i32
    return %c0_i32, %c0_i32_0 : i32, i32
  }
  func.func @transform_3(%arg0: i32) -> (i32, i32) {
    %c0_i32 = arith.constant 0 : i32
    %c0_i32_0 = arith.constant 0 : i32
    return %arg0, %c0_i32 : i32, i32
  }
}

</mosaic_0001>

<bundles_post_ra>
// kernel: quantized_linear_forward.1
= control target key start
LH: loop header
LB: loop body
LE: loop exit
PB: predicated region body
PF: predicated region fallthrough
CT: control target
= control target key end

     0   :  { %8 = vsyncpa [#allocation3], 0  ;;  %s1552_s0 = inlined_call_operand.hbm [shape: f32[192,256], index: 0, kind: input, shape index: {}]   ;;  %s1553_s1 = inlined_call_operand.hbm [shape: bf16[256,256], index: 1, kind: input, shape index: {}]   ;;  %s1554_s2 = inlined_call_operand.vmem [shape: f32[1,256], index: 2, kind: input, shape index: {}]   ;;  %s1555_s3 = inlined_call_operand.hbm [shape: f32[192,256], index: 3, kind: output, shape index: {}]  }
   0x1   :  { %10 = vsyncpa [#allocation3 + $0x1], 0 }
   0x2   :  { %11 = vsyncpa [#allocation6], 0 }
   0x3   :  { %12 = vsyncpa [#allocation4], 0 }
   0x4   :  { %14 = vsyncpa [#allocation4 + $0x1], 0  ;;  %s1242_s12 = smov 0   ;;  %s1244_s13 = smov 0  }
   0x5   :  { %s1246_s14 = smov 0   ;;  %s1248_s15 = smov 0  }
   0x6 LB: > { %s1263_s16 = sadd.s32 4294967295, %s1211_s15   ;;  %s811_s17 = sadd.s32 4294967294, %s1211_s15   ;;  %s1211_s15 = sphi %s1248_s15, %s1572_s15   ;;  %s1207_s14 = sphi %s1246_s14, %s1571_s14   ;;  %s1203_s13 = sphi %s1244_s13, %s1570_s13   ;;  %s1199_s12 = sphi %s1242_s12, %s1569_s12  }
   0x7   : > { %s1267_s18 = sadd.s32 1, %s1211_s15   ;;  %s27_s19 = sadd.s32 1, %s1207_s14 }
   0x8   : > { %s24_s20 = ssub.s32 %s1211_s15, %s1267_s18  ;;  %p34_p0 = scmp.ne.s32.totalorder %s1207_s14, %s1203_s13 }
   0x9   : > { %p25_p1 = scmp.eq.s32.totalorder %s24_s20, 0  ;;  %p35_p2 = scmp.eq.s32.totalorder %s1211_s15, 0 }
   0xa   : > { %p40_p3 = scmp.ne.s32.totalorder %s1203_s13, %s1199_s12  ;;  %p1557_p4 = scmp.eq.s32.totalorder %s1263_s16, 0 }
   0xb   : > { %s1279_s21 = scalar_select %p25_p1, %s1207_s14, %s27_s19  }
   0xc   : > { %p1281_p5 = por %p35_p2, %p34_p0  ;;  %p1287_p6 = por %p1557_p4, %p40_p3 }
   0xd   : > { %p106_p7 = scmp.eq.s32.totalorder %s1263_s16, 1  ;;  %p112_p8 = scmp.eq.s32.totalorder %s811_s17, 1 }
   0xe   : > { %p812_p9 = scmp.ge.s32.totalorder %s1211_s15, 1  ;;  %p119_p10 = scmp.lt.s32.totalorder %s1211_s15, 3 }
   0xf   : > { %p1294_p11 = por %p106_p7, %p34_p0  ;;  %p1298_p12 = por %p112_p8, %p40_p3 }
  0x10   : > { %p1302_p13 = pnand %p812_p9, %p119_p10  ;;  %s130_s29 = sshll.u32 %s1553_s1, 4  ;;  %s131_s29 = int_to_ptr.hbm [resolvable:$true] %s130_s29 }
  0x11   : > { %s1561_s25 = scalar_select %p1298_p12, 1, 0 }
  0x12   : > { %p1011_p1 = pneg %p1302_p13  ;;  %s1213_s30 = smov [#allocation5]  }
  0x13   : > { %s132_s4 = sshll.u32 %s1213_s30, 4  ;;  %s1214_s5 = smov 128   ;;  %s133_s4 = int_to_ptr.vmem [resolvable:$true] %s132_s4 }
  0x14   : > { %p1012_p0 = pnand %p1011_p1, %p1557_p4  ;;  %s1215_s6 = smov 8  }
  0x15   : > { %p1556_p2 = scmp.ge.s32.totalorder %s1211_s15, 2 }
  0x16   : > { %1014 = dma.hbm_to_vmem [thread:$0]  (!%p1012_p0), %s131_s29, 4096, %s133_s4, [#allocation6], %s1214_s5, %s1214_s5, %s1215_s6  }
  0x17   : > { %145 = sbr.rel (%p1556_p2) target bundleno = 64 (0x40), region = 24 }
  0x1c   : > { %148 = sbr.rel (!%p1281_p5) target bundleno = 64 (0x40), region = 28  ;;  %s149_s7 = sand.u32 (%p1281_p5), 1, %s1207_s14  }
  0x1d   : > { %s816_s8 = sshll.u32 (%p1281_p5), %s1211_s15, 4  ;;  %s815_s9 = sshll.u32 (%p1281_p5), %s149_s7, 8 }
  0x1e   : > { %s155_s10 = ssub.s32 (%p1281_p5), 24, %s816_s8  ;;  %s1323_s20 = scalar_lea.sflag (%p1281_p5), [#allocation3], %s149_s7 }
  0x1f   : > { %p156_p3 = scmp.lt.s32.totalorder (%p1281_p5), %s155_s10, 16  ;;  %s153_s27 = scalar_lea.vmem (%p1281_p5), [#allocation2], %s815_s9 }
  0x21   : > { %s1574_s10 = smov (!%p156_p3, %s155_s10), 16 }
  0x22   : > { %s967_s11 = sshll.u32 %s1574_s10, 4 }
  0x23   : > { %s160_s17 = ssub.s32 256, %s967_s11 }
  0x24   : > { %s161_s19 = sshll.u32 %s160_s17, 4 }
  0x25   : > { %162 = vsyncadd %s1323_s20, %s161_s19  ;;  %p1326_p5 = scmp.ne.s32.totalorder %s967_s11, 0  ;;  %s969_s28 = sshll.u32 %s1211_s15, 8 }
  0x26   : > { %s166_s4 = scalar_lea.hbm %s1552_s0, %s969_s28  ;;  %s1334_s5 = sshll.u32 %s153_s27, 4  ;;  %s171_s5 = int_to_ptr.vmem [resolvable:$true] %s1334_s5 }
  0x27   : > { %s168_s6 = sshll.u32 %s166_s4, 4  ;;  %s823_s7 = sshll.u32 %s1574_s10, 8  ;;  %s1337_s6 = int_to_ptr.hbm [resolvable:$true] %s168_s6 }
  0x28   : > { %s1091_s8 = sshra.s32 %s1337_s6, 4  ;;  %s1093_s9 = sshrl.u32 %s823_s7, 4  ;;  %s1092_s8 = int_to_ptr.hbm [resolvable:$true] %s1091_s8 }
  0x29   : > { %s1098_s11 = scalar_lea.hbm %s1092_s8, %s1093_s9  ;;  %s1102_s27 = scalar_lea.hbm %s1552_s0, 384 }
  0x2a   : > { %p1099_p7 = scmp.ne.s32.totalorder %s1092_s8, %s1098_s11  ;;  %p1103_p10 = scmp.lt.s32.totalorder %s1092_s8, %s1552_s0 }
  0x2b   : > { %p1104_p1 = scmp.lt.s32.totalorder %s1102_s27, %s1098_s11 }
  0x2c   : > { %p1100_p8 = pnand %p1099_p7, %p1326_p5 }
  0x2d   : > { %p1105_p0 = por %p1104_p1, %p1103_p10 }
  0x2e   : > { %p1101_p9 = pneg %p1100_p8 }
  0x30   : > { %p1106_p3 = pnand %p1105_p0, %p1101_p9 }
  0x32   : > { %1109 = shalt.err (!%p1106_p3)
}
  0x33   : > { %s1110_s30 = sshra.s32 %s171_s5, 4  ;;  %s1216_s17 = smov [#allocation2]   ;;  %s1111_s30 = int_to_ptr.vmem [resolvable:$true] %s1110_s30 }
  0x34   : > { %s1117_s4 = scalar_lea.vmem %s1111_s30, %s1093_s9  ;;  %s1121_s19 = scalar_lea.vmem %s1216_s17, 512 }
  0x35   : > { %p1118_p7 = scmp.ne.s32.totalorder %s1111_s30, %s1117_s4  ;;  %p1123_p4 = scmp.lt.s32.totalorder %s1121_s19, %s1117_s4 }
  0x37   : > { %p1119_p8 = pnand %p1118_p7, %p1326_p5 }
  0x39   : > { %p1120_p2 = pneg %p1119_p8 }
  0x3b   : > { %p1125_p12 = pnand %p1123_p4, %p1120_p2 }
  0x3d   : > { %1128 = shalt.err (!%p1125_p12)
}
  0x3e   : > { %s1217_s8 = smov 256   ;;  %s1218_s11 = smov 16  }
  0x3f   : > { %176 = dma.hbm_to_vmem [thread:$0]  (%p1326_p5), %s1337_s6, %s823_s7, %s171_s5, %s1323_s20, %s1217_s8, %s1217_s8, %s1218_s11  }
  0x40 PF: > { %182 = sbr.rel (%p1302_p13) target bundleno = 397 (0x18d), region = 32  ;;  %s1366_s9 = sand.u32 (!%p1302_p13), 1, %s1203_s13  }
  0x41   : > { %s825_s27 = sshll.u32 (!%p1302_p13), %s1366_s9, 8  ;;  %s185_s28 = scalar_lea.sflag (!%p1302_p13), [#allocation3], %s1366_s9 }
  0x42   : > { %s1372_s29 = scalar_lea.vmem (!%p1302_p13), [#allocation2], %s825_s27 }
  0x45   : > { %1186 = dma.done.wait (%p1287_p6), %s185_s28, 4096  }
  0x46   : > { %1188 = vsyncadd (%p1287_p6), %s185_s28, 4294963200  ;;  %p1564_p4 = scmp.eq.s32.totalorder %s1263_s16, 0 }
  0x48   : > { %1190 = dma.done.wait (%p1564_p4), [#allocation6], 4096   ;;  %p1565_p12 = pmov %p1564_p4 }
  0x49   : > { %v886_v0 = vld [vmem:[#allocation5 + $0x70] sm:$0xf]  ;;  %v985_v1 = vld [vmem:[#allocation5 + $0x74] sm:$0xf0]  ;;  %v984_v5 = vld [vmem:[#allocation5 + $0x74] sm:$0xf] }
  0x4a   : > { %1192 = vsyncadd (%p1565_p12), [#allocation6], 4294963200  ;;  %v950_v2 = vld [vmem:[#allocation5 + $0xf0] sm:$0xf]  ;;  %v887_v3 = vor.u32 %v985_v1, %v886_v0  ;;  %v1001_v4 = vld [vmem:[#allocation5 + $0xf4] sm:$0xf0] }
  0x4b   : > { %v888_v6 = vld [vmem:[#allocation5 + $0x78] sm:$0xf0]  ;;  %v951_v7 = vor.u32 %v1001_v4, %v950_v2  ;;  %v1000_v9 = vld [vmem:[#allocation5 + $0xf4] sm:$0xf]  ;;  %v878_v11 = vld [vmem:[#allocation5 + $0x60] sm:$0xf] }
  0x4c   : > { %v891_v8 = vor.u32 %v984_v5, %v888_v6  ;;  %v952_v10 = vld [vmem:[#allocation5 + $0xf8] sm:$0xf0]  ;;  %475 = vmatpush.bf16.msra.mxu0 %v887_v3  ;;  %v983_v13 = vld [vmem:[#allocation5 + $0x64] sm:$0xf0]  ;;  %v942_v14 = vld [vmem:[#allocation5 + $0xe0] sm:$0xf] }
  0x4d   : > { %v955_v12 = vor.u32 %v1000_v9, %v952_v10  ;;  %v999_v15 = vld [vmem:[#allocation5 + $0xe4] sm:$0xf0]  ;;  %524 = vmatpush.bf16.msra.mxu1 %v951_v7  ;;  %v879_v16 = vor.u32 %v983_v13, %v878_v11  ;;  %v982_v18 = vld [vmem:[#allocation5 + $0x64] sm:$0xf]  ;;  %v880_v19 = vld [vmem:[#allocation5 + $0x68] sm:$0xf0] }
  0x4e   : > { %573 = vmatpush.bf16.msra.mxu2 %v891_v8  ;;  %v943_v17 = vor.u32 %v999_v15, %v942_v14  ;;  %v998_v20 = vld [vmem:[#allocation5 + $0xe4] sm:$0xf]  ;;  %v883_v21 = vor.u32 %v982_v18, %v880_v19  ;;  %v944_v22 = vld [vmem:[#allocation5 + $0xe8] sm:$0xf0]  ;;  %v870_v23 = vld [vmem:[#allocation5 + $0x50] sm:$0xf] }
  0x4f   : > { %622 = vmatpush.bf16.msra.mxu3 %v955_v12  ;;  %v981_v24 = vld [vmem:[#allocation5 + $0x54] sm:$0xf0]  ;;  %v947_v25 = vor.u32 %v998_v20, %v944_v22  ;;  %v934_v26 = vld [vmem:[#allocation5 + $0xd0] sm:$0xf]  ;;  %v980_v28 = vld [vmem:[#allocation5 + $0x54] sm:$0xf] }
  0x50   : > { %v997_v27 = vld [vmem:[#allocation5 + $0xd4] sm:$0xf0]  ;;  %476 = vmatpush.bf16.msra.mxu0 %v879_v16  ;;  %v871_v29 = vor.u32 %v981_v24, %v870_v23  ;;  %v872_v30 = vld [vmem:[#allocation5 + $0x58] sm:$0xf0]  ;;  %v996_v31 = vld [vmem:[#allocation5 + $0xd4] sm:$0xf] }
  0x51   : > { %v936_v32 = vld [vmem:[#allocation5 + $0xd8] sm:$0xf0]  ;;  %525 = vmatpush.bf16.msra.mxu1 %v943_v17  ;;  %v935_v33 = vor.u32 %v997_v27, %v934_v26  ;;  %v875_v34 = vor.u32 %v980_v28, %v872_v30  ;;  %v862_v35 = vld [vmem:[#allocation5 + $0x40] sm:$0xf]  ;;  %v979_v36 = vld [vmem:[#allocation5 + $0x44] sm:$0xf0] }
  0x52   : > { %574 = vmatpush.bf16.msra.mxu2 %v883_v21  ;;  %v926_v37 = vld [vmem:[#allocation5 + $0xc0] sm:$0xf]  ;;  %v939_v38 = vor.u32 %v996_v31, %v936_v32  ;;  %v995_v39 = vld [vmem:[#allocation5 + $0xc4] sm:$0xf0]  ;;  %v978_v40 = vld [vmem:[#allocation5 + $0x44] sm:$0xf]  ;;  %v863_v44 = vor.u32 %v979_v36, %v862_v35 }
  0x53   : > { %623 = vmatpush.bf16.msra.mxu3 %v947_v25  ;;  %v864_v41 = vld [vmem:[#allocation5 + $0x48] sm:$0xf0]  ;;  %v994_v42 = vld [vmem:[#allocation5 + $0xc4] sm:$0xf]  ;;  %v927_v45 = vor.u32 %v995_v39, %v926_v37  ;;  %v854_v47 = vld [vmem:[#allocation5 + $0x30] sm:$0xf] }
  0x54   : > { %v928_v43 = vld [vmem:[#allocation5 + $0xc8] sm:$0xf0]  ;;  %477 = vmatpush.bf16.msra.mxu0 %v871_v29  ;;  %v867_v46 = vor.u32 %v978_v40, %v864_v41  ;;  %v977_v48 = vld [vmem:[#allocation5 + $0x34] sm:$0xf0]  ;;  %v918_v49 = vld [vmem:[#allocation5 + $0xb0] sm:$0xf] }
  0x55   : > { %526 = vmatpush.bf16.msra.mxu1 %v935_v33  ;;  %v931_v50 = vor.u32 %v994_v42, %v928_v43  ;;  %v993_v51 = vld [vmem:[#allocation5 + $0xb4] sm:$0xf0]  ;;  %v976_v52 = vld [vmem:[#allocation5 + $0x34] sm:$0xf]  ;;  %v856_v53 = vld [vmem:[#allocation5 + $0x38] sm:$0xf0]  ;;  %v855_v56 = vor.u32 %v977_v48, %v854_v47 }
  0x56   : > { %575 = vmatpush.bf16.msra.mxu2 %v875_v34  ;;  %v992_v54 = vld [vmem:[#allocation5 + $0xb4] sm:$0xf]  ;;  %v920_v55 = vld [vmem:[#allocation5 + $0xb8] sm:$0xf0]  ;;  %v919_v57 = vor.u32 %v993_v51, %v918_v49  ;;  %v859_v58 = vor.u32 %v976_v52, %v856_v53  ;;  %v846_v59 = vld [vmem:[#allocation5 + $0x20] sm:$0xf] }
  0x57   : > { %624 = vmatpush.bf16.msra.mxu3 %v939_v38  ;;  %v975_v60 = vld [vmem:[#allocation5 + $0x24] sm:$0xf0]  ;;  %v910_v61 = vld [vmem:[#allocation5 + $0xa0] sm:$0xf]  ;;  %v923_v62 = vor.u32 %v992_v54, %v920_v55  ;;  %v974_v0 = vld [vmem:[#allocation5 + $0x24] sm:$0xf] }
  0x58   : > { %478 = vmatpush.bf16.msra.mxu0 %v863_v44  ;;  %v991_v63 = vld [vmem:[#allocation5 + $0xa4] sm:$0xf0]  ;;  %v848_v1 = vld [vmem:[#allocation5 + $0x28] sm:$0xf0]  ;;  %v990_v2 = vld [vmem:[#allocation5 + $0xa4] sm:$0xf]  ;;  %v847_v4 = vor.u32 %v975_v60, %v846_v59 }
  0x59   : > { %527 = vmatpush.bf16.msra.mxu1 %v927_v45  ;;  %v912_v3 = vld [vmem:[#allocation5 + $0xa8] sm:$0xf0]  ;;  %v911_v5 = vor.u32 %v991_v63, %v910_v61  ;;  %v851_v6 = vor.u32 %v974_v0, %v848_v1  ;;  %v838_v7 = vld [vmem:[#allocation5 + $0x10] sm:$0xf]  ;;  %v973_v8 = vld [vmem:[#allocation5 + $0x14] sm:$0xf0] }
  0x5a   : > { %576 = vmatpush.bf16.msra.mxu2 %v867_v46  ;;  %v902_v9 = vld [vmem:[#allocation5 + $0x90] sm:$0xf]  ;;  %v915_v10 = vor.u32 %v990_v2, %v912_v3  ;;  %v989_v11 = vld [vmem:[#allocation5 + $0x94] sm:$0xf0]  ;;  %v972_v12 = vld [vmem:[#allocation5 + $0x14] sm:$0xf]  ;;  %v839_v16 = vor.u32 %v973_v8, %v838_v7 }
  0x5b   : > { %625 = vmatpush.bf16.msra.mxu3 %v931_v50  ;;  %v840_v13 = vld [vmem:[#allocation5 + $0x18] sm:$0xf0]  ;;  %v988_v14 = vld [vmem:[#allocation5 + $0x94] sm:$0xf]  ;;  %v903_v17 = vor.u32 %v989_v11, %v902_v9  ;;  %v830_v19 = vld [vmem:[#allocation5] sm:$0xf] }
  0x5c   : > { %479 = vmatpush.bf16.msra.mxu0 %v855_v56  ;;  %v904_v15 = vld [vmem:[#allocation5 + $0x98] sm:$0xf0]  ;;  %v843_v18 = vor.u32 %v972_v12, %v840_v13  ;;  %v971_v20 = vld [vmem:[#allocation5 + $0x4] sm:$0xf0]  ;;  %v894_v21 = vld [vmem:[#allocation5 + $0x80] sm:$0xf] }
  0x5d   : > { %528 = vmatpush.bf16.msra.mxu1 %v919_v57  ;;  %v907_v22 = vor.u32 %v988_v14, %v904_v15  ;;  %v987_v23 = vld [vmem:[#allocation5 + $0x84] sm:$0xf0]  ;;  %v970_v24 = vld [vmem:[#allocation5 + $0x4] sm:$0xf]  ;;  %v832_v25 = vld [vmem:[#allocation5 + $0x8] sm:$0xf0]  ;;  %v831_v28 = vor.u32 %v971_v20, %v830_v19 }
  0x5e   : > { %577 = vmatpush.bf16.msra.mxu2 %v859_v58  ;;  %v986_v26 = vld [vmem:[#allocation5 + $0x84] sm:$0xf]  ;;  %v896_v27 = vld [vmem:[#allocation5 + $0x88] sm:$0xf0]  ;;  %v231_v30 = vld [vmem:[%s1372_s29 + $0x10] sm:$0xff]  ;;  %v895_v31 = vor.u32 %v987_v23, %v894_v21  ;;  %v835_v32 = vor.u32 %v970_v24, %v832_v25  ;;  %s1424_s10 = scalar_lea.vmem [#allocation7], %s825_s27 }
  0x5f   : > { %626 = vmatpush.bf16.msra.mxu3 %v923_v62  ;;  %v229_v29 = vld [vmem:[%s1372_s29] sm:$0xff]  ;;  %v230_v33 = vld [vmem:[%s1372_s29 + $0x8] sm:$0xff]  ;;  %v232_v34 = vld [vmem:[%s1372_s29 + $0x18] sm:$0xff]  ;;  %v899_v35 = vor.u32 %v986_v26, %v896_v27  ;;  %s704_s20 = scalar_lea.sflag [#allocation4], %s1366_s9  ;;  %s957_s22 = sshll.u32 (%p1294_p11), %s1263_s16, 4 }
  0x60   : > { %480 = vmatpush.bf16.msra.mxu0 %v847_v4  ;;  %v261_v36 = vpack.c.bf16 %v231_v30, %v229_v29  ;;  %v262_v37 = vpack.c.bf16 %v232_v34, %v230_v33  ;;  %v233_v38 = vld [vmem:[%s1372_s29 + $0x20] sm:$0xff]  ;;  %v235_v39 = vld [vmem:[%s1372_s29 + $0x30] sm:$0xff]  ;;  %v234_v40 = vld [vmem:[%s1372_s29 + $0x28] sm:$0xff]  ;;  %s712_s5 = ssub.s32 (%p1294_p11), 24, %s957_s22 }
  0x61   : > { %529 = vmatpush.bf16.msra.mxu1 %v911_v5  ;;  %v236_v41 = vld [vmem:[%s1372_s29 + $0x38] sm:$0xff]  ;;  %v263_v42 = vpack.c.bf16 %v235_v39, %v233_v38  ;;  %v237_v44 = vld [vmem:[%s1372_s29 + $0x40] sm:$0xff]  ;;  %v239_v45 = vld [vmem:[%s1372_s29 + $0x50] sm:$0xff]  ;;  %p713_p6 = scmp.lt.s32.totalorder (%p1294_p11), %s712_s5, 16 }
  0x62   : > { %578 = vmatpush.bf16.msra.mxu2 %v851_v6  ;;  %v264_v43 = vpack.c.bf16 %v236_v41, %v234_v40  ;;  %v238_v46 = vld [vmem:[%s1372_s29 + $0x48] sm:$0xff]  ;;  %v240_v47 = vld [vmem:[%s1372_s29 + $0x58] sm:$0xff]  ;;  %v265_v48 = vpack.c.bf16 %v239_v45, %v237_v44  ;;  %v241_v50 = vld [vmem:[%s1372_s29 + $0x60] sm:$0xff] }
  0x63   : > { %627 = vmatpush.bf16.msra.mxu3 %v915_v10  ;;  %v266_v49 = vpack.c.bf16 %v240_v47, %v238_v46  ;;  %v243_v51 = vld [vmem:[%s1372_s29 + $0x70] sm:$0xff]  ;;  %v242_v52 = vld [vmem:[%s1372_s29 + $0x68] sm:$0xff]  ;;  %v244_v53 = vld [vmem:[%s1372_s29 + $0x78] sm:$0xff] }
  0x64   : > { %481 = vmatpush.bf16.msra.mxu0 %v839_v16  ;;  %v267_v54 = vpack.c.bf16 %v243_v51, %v241_v50  ;;  %v268_v55 = vpack.c.bf16 %v244_v53, %v242_v52  ;;  %v245_v56 = vld [vmem:[%s1372_s29 + $0x80] sm:$0xff]  ;;  %v247_v57 = vld [vmem:[%s1372_s29 + $0x90] sm:$0xff]  ;;  %v246_v58 = vld [vmem:[%s1372_s29 + $0x88] sm:$0xff] }
  0x65   : > { %530 = vmatpush.bf16.msra.mxu1 %v903_v17  ;;  %v248_v59 = vld [vmem:[%s1372_s29 + $0x98] sm:$0xff]  ;;  %v269_v60 = vpack.c.bf16 %v247_v57, %v245_v56  ;;  %v249_v62 = vld [vmem:[%s1372_s29 + $0xa0] sm:$0xff]  ;;  %v251_v63 = vld [vmem:[%s1372_s29 + $0xb0] sm:$0xff] }
  0x66   : > { %579 = vmatpush.bf16.msra.mxu2 %v843_v18  ;;  %v270_v61 = vpack.c.bf16 %v248_v59, %v246_v58  ;;  %v250_v0 = vld [vmem:[%s1372_s29 + $0xa8] sm:$0xff]  ;;  %v252_v1 = vld [vmem:[%s1372_s29 + $0xb8] sm:$0xff]  ;;  %v271_v2 = vpack.c.bf16 %v251_v63, %v249_v62  ;;  %v253_v4 = vld [vmem:[%s1372_s29 + $0xc0] sm:$0xff] }
  0x67   : > { %628 = vmatpush.bf16.msra.mxu3 %v907_v22  ;;  %v272_v3 = vpack.c.bf16 %v252_v1, %v250_v0  ;;  %v255_v5 = vld [vmem:[%s1372_s29 + $0xd0] sm:$0xff]  ;;  %v254_v6 = vld [vmem:[%s1372_s29 + $0xc8] sm:$0xff]  ;;  %v256_v7 = vld [vmem:[%s1372_s29 + $0xd8] sm:$0xff] }
  0x68   : > { %482 = vmatpush.bf16.msra.mxu0 %v831_v28  ;;  %v273_v8 = vpack.c.bf16 %v255_v5, %v253_v4  ;;  %v274_v9 = vpack.c.bf16 %v256_v7, %v254_v6  ;;  %v257_v10 = vld [vmem:[%s1372_s29 + $0xe0] sm:$0xff]  ;;  %v259_v11 = vld [vmem:[%s1372_s29 + $0xf0] sm:$0xff]  ;;  %v258_v12 = vld [vmem:[%s1372_s29 + $0xe8] sm:$0xff] }
  0x69   : > { %531 = vmatpush.bf16.msra.mxu1 %v895_v31  ;;  %v260_v13 = vld [vmem:[%s1372_s29 + $0xf8] sm:$0xff]  ;;  %v275_v14 = vpack.c.bf16 %v259_v11, %v257_v10  ;;  %v309_v16 = vld [vmem:[%s1554_s2] sm:$0x3] }
  0x6a   : > { %580 = vmatpush.bf16.msra.mxu2 %v835_v32  ;;  %v276_v15 = vpack.c.bf16 %v260_v13, %v258_v12  ;;  %v1417_v17 = vperm.slane %v309_v16, 0  ;;  %v1420_v22 = vperm.slane %v309_v16, 1 }
  0x6b   : > { %629 = vmatpush.bf16.msra.mxu3 %v899_v35  ;;  %483 = vmatmul.bf16.vlgmr.msra.gmra.mxu0 %v261_v36 }
  0x6c   : > { %532 = vmatmul.bf16.vlgmr.msra.gmra.mxu1 %v262_v37 }
  0x6d   : > { %581 = vmatmul.bf16.vlgmr.msra.gmra.mxu2 %v261_v36 }
  0x6e   : > { %630 = vmatmul.bf16.vlgmr.msra.gmra.mxu3 %v262_v37 }
  0x7b   : > { %488 = vmatmul.bf16.gmra.mxu0 %v263_v42 }
  0x7c   : > { %537 = vmatmul.bf16.gmra.mxu1 %v264_v43 }
  0x7d   : > { %586 = vmatmul.bf16.gmra.mxu2 %v263_v42 }
  0x7e   : > { %635 = vmatmul.bf16.gmra.mxu3 %v264_v43 }
  0x8b   : > { %493 = vmatmul.bf16.gmra.mxu0 %v265_v48 }
  0x8c   : > { %542 = vmatmul.bf16.gmra.mxu1 %v266_v49 }
  0x8d   : > { %591 = vmatmul.bf16.gmra.mxu2 %v265_v48 }
  0x8e   : > { %640 = vmatmul.bf16.gmra.mxu3 %v266_v49 }
  0x9b   : > { %498 = vmatmul.bf16.gmra.mxu0 %v267_v54 }
  0x9c   : > { %547 = vmatmul.bf16.gmra.mxu1 %v268_v55 }
  0x9d   : > { %596 = vmatmul.bf16.gmra.mxu2 %v267_v54 }
  0x9e   : > { %645 = vmatmul.bf16.gmra.mxu3 %v268_v55 }
  0xab   : > { %503 = vmatmul.bf16.gmra.mxu0 %v269_v60 }
  0xac   : > { %552 = vmatmul.bf16.gmra.mxu1 %v270_v61 }
  0xad   : > { %601 = vmatmul.bf16.gmra.mxu2 %v269_v60 }
  0xae   : > { %650 = vmatmul.bf16.gmra.mxu3 %v270_v61 }
  0xbb   : > { %508 = vmatmul.bf16.gmra.mxu0 %v271_v2 }
  0xbc   : > { %557 = vmatmul.bf16.gmra.mxu1 %v272_v3 }
  0xbd   : > { %606 = vmatmul.bf16.gmra.mxu2 %v271_v2 }
  0xbe   : > { %655 = vmatmul.bf16.gmra.mxu3 %v272_v3 }
  0xcb   : > { %513 = vmatmul.bf16.gmra.mxu0 %v273_v8 }
  0xcc   : > { %562 = vmatmul.bf16.gmra.mxu1 %v274_v9 }
  0xcd   : > { %611 = vmatmul.bf16.gmra.mxu2 %v273_v8 }
  0xce   : > { %660 = vmatmul.bf16.gmra.mxu3 %v274_v9 }
  0xdb   : > { %518 = vmatmul.bf16.gmra.mxu0 %v275_v14 }
  0xdc   : > { %567 = vmatmul.bf16.gmra.mxu1 %v276_v15 }
  0xdd   : > { %616 = vmatmul.bf16.gmra.mxu2 %v275_v14 }
  0xde   : > { %665 = vmatmul.bf16.gmra.mxu3 %v276_v15 }
  0xe8   : > { %v484_v18 = vpop.f32.mrf.mxu0 }
  0xe9   : > { %v485_v19 = vadd.f32 %v484_v18, %v1417_v17  ;;  %v533_v20 = vpop.f32.mrf.mxu1 }
  0xeb   : > { %v534_v21 = vadd.f32 %v533_v20, %v485_v19 }
  0xed   : > { %671 = vst [vmem:[%s1424_s10] sm:$0xff] %v534_v21 }
  0xf0   : > { %v582_v23 = vpop.f32.mrf.mxu2  ;;  %v486_v26 = vpop.f32.mrf.mxu0 }
  0xf1   : > { %v583_v24 = vadd.f32 %v582_v23, %v1420_v22  ;;  %v631_v25 = vpop.f32.mrf.mxu3  ;;  %v487_v27 = vadd.f32 %v486_v26, %v1417_v17  ;;  %v535_v28 = vpop.f32.mrf.mxu1 }
  0xf3   : > { %v632_v29 = vadd.f32 %v631_v25, %v583_v24  ;;  %v536_v30 = vadd.f32 %v535_v28, %v487_v27 }
  0xf5   : > { %672 = vst [vmem:[%s1424_s10 + $0x8] sm:$0xff] %v632_v29 }
  0xf6   : > { %673 = vst [vmem:[%s1424_s10 + $0x10] sm:$0xff] %v536_v30 }
  0xf8   : > { %v584_v31 = vpop.f32.mrf.mxu2  ;;  %v489_v34 = vpop.f32.mrf.mxu0 }
  0xf9   : > { %v585_v32 = vadd.f32 %v584_v31, %v1420_v22  ;;  %v633_v33 = vpop.f32.mrf.mxu3  ;;  %v490_v35 = vadd.f32 %v489_v34, %v1417_v17  ;;  %v538_v36 = vpop.f32.mrf.mxu1 }
  0xfb   : > { %v634_v37 = vadd.f32 %v633_v33, %v585_v32  ;;  %v539_v38 = vadd.f32 %v538_v36, %v490_v35 }
  0xfd   : > { %674 = vst [vmem:[%s1424_s10 + $0x18] sm:$0xff] %v634_v37 }
  0xfe   : > { %675 = vst [vmem:[%s1424_s10 + $0x20] sm:$0xff] %v539_v38 }
 0x100   : > { %v587_v39 = vpop.f32.mrf.mxu2  ;;  %v491_v42 = vpop.f32.mrf.mxu0 }
 0x101   : > { %v588_v40 = vadd.f32 %v587_v39, %v1420_v22  ;;  %v636_v41 = vpop.f32.mrf.mxu3  ;;  %v492_v43 = vadd.f32 %v491_v42, %v1417_v17  ;;  %v540_v44 = vpop.f32.mrf.mxu1 }
 0x103   : > { %v637_v45 = vadd.f32 %v636_v41, %v588_v40  ;;  %v541_v46 = vadd.f32 %v540_v44, %v492_v43 }
 0x105   : > { %676 = vst [vmem:[%s1424_s10 + $0x28] sm:$0xff] %v637_v45 }
 0x106   : > { %677 = vst [vmem:[%s1424_s10 + $0x30] sm:$0xff] %v541_v46 }
 0x108   : > { %v589_v47 = vpop.f32.mrf.mxu2  ;;  %v494_v50 = vpop.f32.mrf.mxu0 }
 0x109   : > { %v590_v48 = vadd.f32 %v589_v47, %v1420_v22  ;;  %v638_v49 = vpop.f32.mrf.mxu3  ;;  %v495_v51 = vadd.f32 %v494_v50, %v1417_v17  ;;  %v543_v52 = vpop.f32.mrf.mxu1 }
 0x10b   : > { %v639_v53 = vadd.f32 %v638_v49, %v590_v48  ;;  %v544_v54 = vadd.f32 %v543_v52, %v495_v51 }
 0x10d   : > { %678 = vst [vmem:[%s1424_s10 + $0x38] sm:$0xff] %v639_v53 }
 0x10e   : > { %679 = vst [vmem:[%s1424_s10 + $0x40] sm:$0xff] %v544_v54 }
 0x110   : > { %v592_v55 = vpop.f32.mrf.mxu2  ;;  %v496_v58 = vpop.f32.mrf.mxu0 }
 0x111   : > { %v593_v56 = vadd.f32 %v592_v55, %v1420_v22  ;;  %v641_v57 = vpop.f32.mrf.mxu3  ;;  %v497_v59 = vadd.f32 %v496_v58, %v1417_v17  ;;  %v545_v60 = vpop.f32.mrf.mxu1 }
 0x113   : > { %v642_v61 = vadd.f32 %v641_v57, %v593_v56  ;;  %v546_v62 = vadd.f32 %v545_v60, %v497_v59 }
 0x115   : > { %680 = vst [vmem:[%s1424_s10 + $0x48] sm:$0xff] %v642_v61 }
 0x116   : > { %681 = vst [vmem:[%s1424_s10 + $0x50] sm:$0xff] %v546_v62 }
 0x118   : > { %v594_v63 = vpop.f32.mrf.mxu2  ;;  %v499_v2 = vpop.f32.mrf.mxu0 }
 0x119   : > { %v595_v0 = vadd.f32 %v594_v63, %v1420_v22  ;;  %v643_v1 = vpop.f32.mrf.mxu3  ;;  %v500_v3 = vadd.f32 %v499_v2, %v1417_v17  ;;  %v548_v4 = vpop.f32.mrf.mxu1 }
 0x11b   : > { %v644_v5 = vadd.f32 %v643_v1, %v595_v0  ;;  %v549_v6 = vadd.f32 %v548_v4, %v500_v3 }
 0x11d   : > { %682 = vst [vmem:[%s1424_s10 + $0x58] sm:$0xff] %v644_v5 }
 0x11e   : > { %683 = vst [vmem:[%s1424_s10 + $0x60] sm:$0xff] %v549_v6 }
 0x120   : > { %v597_v7 = vpop.f32.mrf.mxu2  ;;  %v501_v10 = vpop.f32.mrf.mxu0 }
 0x121   : > { %v598_v8 = vadd.f32 %v597_v7, %v1420_v22  ;;  %v646_v9 = vpop.f32.mrf.mxu3  ;;  %v502_v11 = vadd.f32 %v501_v10, %v1417_v17  ;;  %v550_v12 = vpop.f32.mrf.mxu1 }
 0x123   : > { %v647_v13 = vadd.f32 %v646_v9, %v598_v8  ;;  %v551_v14 = vadd.f32 %v550_v12, %v502_v11 }
 0x125   : > { %684 = vst [vmem:[%s1424_s10 + $0x68] sm:$0xff] %v647_v13 }
 0x126   : > { %685 = vst [vmem:[%s1424_s10 + $0x70] sm:$0xff] %v551_v14 }
 0x128   : > { %v599_v15 = vpop.f32.mrf.mxu2  ;;  %v504_v19 = vpop.f32.mrf.mxu0 }
 0x129   : > { %v600_v16 = vadd.f32 %v599_v15, %v1420_v22  ;;  %v648_v18 = vpop.f32.mrf.mxu3  ;;  %v505_v20 = vadd.f32 %v504_v19, %v1417_v17  ;;  %v553_v21 = vpop.f32.mrf.mxu1 }
 0x12b   : > { %v649_v23 = vadd.f32 %v648_v18, %v600_v16  ;;  %v554_v24 = vadd.f32 %v553_v21, %v505_v20 }
 0x12d   : > { %686 = vst [vmem:[%s1424_s10 + $0x78] sm:$0xff] %v649_v23 }
 0x12e   : > { %687 = vst [vmem:[%s1424_s10 + $0x80] sm:$0xff] %v554_v24 }
 0x130   : > { %v602_v25 = vpop.f32.mrf.mxu2  ;;  %v506_v28 = vpop.f32.mrf.mxu0 }
 0x131   : > { %v603_v26 = vadd.f32 %v602_v25, %v1420_v22  ;;  %v651_v27 = vpop.f32.mrf.mxu3  ;;  %v507_v29 = vadd.f32 %v506_v28, %v1417_v17  ;;  %v555_v30 = vpop.f32.mrf.mxu1 }
 0x133   : > { %v652_v31 = vadd.f32 %v651_v27, %v603_v26  ;;  %v556_v32 = vadd.f32 %v555_v30, %v507_v29 }
 0x135   : > { %688 = vst [vmem:[%s1424_s10 + $0x88] sm:$0xff] %v652_v31 }
 0x136   : > { %689 = vst [vmem:[%s1424_s10 + $0x90] sm:$0xff] %v556_v32 }
 0x138   : > { %v604_v33 = vpop.f32.mrf.mxu2  ;;  %v509_v36 = vpop.f32.mrf.mxu0 }
 0x139   : > { %v605_v34 = vadd.f32 %v604_v33, %v1420_v22  ;;  %v653_v35 = vpop.f32.mrf.mxu3  ;;  %v510_v37 = vadd.f32 %v509_v36, %v1417_v17  ;;  %v558_v38 = vpop.f32.mrf.mxu1 }
 0x13b   : > { %v654_v39 = vadd.f32 %v653_v35, %v605_v34  ;;  %v559_v40 = vadd.f32 %v558_v38, %v510_v37 }
 0x13d   : > { %690 = vst [vmem:[%s1424_s10 + $0x98] sm:$0xff] %v654_v39 }
 0x13e   : > { %691 = vst [vmem:[%s1424_s10 + $0xa0] sm:$0xff] %v559_v40 }
 0x140   : > { %v607_v41 = vpop.f32.mrf.mxu2  ;;  %v511_v44 = vpop.f32.mrf.mxu0 }
 0x141   : > { %v608_v42 = vadd.f32 %v607_v41, %v1420_v22  ;;  %v656_v43 = vpop.f32.mrf.mxu3  ;;  %v512_v45 = vadd.f32 %v511_v44, %v1417_v17  ;;  %v560_v46 = vpop.f32.mrf.mxu1 }
 0x143   : > { %v657_v47 = vadd.f32 %v656_v43, %v608_v42  ;;  %v561_v48 = vadd.f32 %v560_v46, %v512_v45 }
 0x145   : > { %692 = vst [vmem:[%s1424_s10 + $0xa8] sm:$0xff] %v657_v47 }
 0x146   : > { %693 = vst [vmem:[%s1424_s10 + $0xb0] sm:$0xff] %v561_v48 }
 0x148   : > { %v609_v49 = vpop.f32.mrf.mxu2  ;;  %v514_v52 = vpop.f32.mrf.mxu0 }
 0x149   : > { %v610_v50 = vadd.f32 %v609_v49, %v1420_v22  ;;  %v658_v51 = vpop.f32.mrf.mxu3  ;;  %v515_v53 = vadd.f32 %v514_v52, %v1417_v17  ;;  %v563_v54 = vpop.f32.mrf.mxu1 }
 0x14b   : > { %v659_v55 = vadd.f32 %v658_v51, %v610_v50  ;;  %v564_v56 = vadd.f32 %v563_v54, %v515_v53 }
 0x14d   : > { %694 = vst [vmem:[%s1424_s10 + $0xb8] sm:$0xff] %v659_v55 }
 0x14e   : > { %695 = vst [vmem:[%s1424_s10 + $0xc0] sm:$0xff] %v564_v56 }
 0x150   : > { %v612_v57 = vpop.f32.mrf.mxu2  ;;  %v516_v60 = vpop.f32.mrf.mxu0 }
 0x151   : > { %v613_v58 = vadd.f32 %v612_v57, %v1420_v22  ;;  %v661_v59 = vpop.f32.mrf.mxu3  ;;  %v517_v61 = vadd.f32 %v516_v60, %v1417_v17  ;;  %v565_v62 = vpop.f32.mrf.mxu1 }
 0x153   : > { %v662_v63 = vadd.f32 %v661_v59, %v613_v58  ;;  %v566_v0 = vadd.f32 %v565_v62, %v517_v61 }
 0x155   : > { %696 = vst [vmem:[%s1424_s10 + $0xc8] sm:$0xff] %v662_v63 }
 0x156   : > { %697 = vst [vmem:[%s1424_s10 + $0xd0] sm:$0xff] %v566_v0 }
 0x158   : > { %v614_v1 = vpop.f32.mrf.mxu2  ;;  %v519_v4 = vpop.f32.mrf.mxu0 }
 0x159   : > { %v615_v2 = vadd.f32 %v614_v1, %v1420_v22  ;;  %v663_v3 = vpop.f32.mrf.mxu3  ;;  %v520_v5 = vadd.f32 %v519_v4, %v1417_v17  ;;  %v568_v6 = vpop.f32.mrf.mxu1 }
 0x15b   : > { %v664_v7 = vadd.f32 %v663_v3, %v615_v2  ;;  %v569_v8 = vadd.f32 %v568_v6, %v520_v5 }
 0x15d   : > { %698 = vst [vmem:[%s1424_s10 + $0xd8] sm:$0xff] %v664_v7 }
 0x15e   : > { %699 = vst [vmem:[%s1424_s10 + $0xe0] sm:$0xff] %v569_v8 }
 0x160   : > { %v617_v9 = vpop.f32.mrf.mxu2  ;;  %v521_v12 = vpop.f32.mrf.mxu0 }
 0x161   : > { %v618_v10 = vadd.f32 %v617_v9, %v1420_v22  ;;  %v666_v11 = vpop.f32.mrf.mxu3  ;;  %v522_v13 = vadd.f32 %v521_v12, %v1417_v17  ;;  %v570_v15 = vpop.f32.mrf.mxu1 }
 0x163   : > { %v667_v14 = vadd.f32 %v666_v11, %v618_v10  ;;  %v571_v16 = vadd.f32 %v570_v15, %v522_v13 }
 0x165   : > { %700 = vst [vmem:[%s1424_s10 + $0xe8] sm:$0xff] %v667_v14 }
 0x166   : > { %701 = vst [vmem:[%s1424_s10 + $0xf0] sm:$0xff] %v571_v16 }
 0x168   : > { %v619_v18 = vpop.f32.mrf.mxu2 }
 0x169   : > { %v620_v19 = vadd.f32 %v619_v18, %v1420_v22  ;;  %v668_v20 = vpop.f32.mrf.mxu3  ;;  %710 = sbr.rel (!%p1294_p11) target bundleno = 397 (0x18d), region = 44 }
 0x16b   : > { %v669_v21 = vadd.f32 %v668_v20, %v620_v19 }
 0x16d   : > { %702 = vst [vmem:[%s1424_s10 + $0xf8] sm:$0xff] %v669_v21 }
 0x16e   : > { %s1576_s5 = smov (!%p713_p6, %s712_s5), 16 }
 0x16f   : > { %s1002_s6 = sshll.u32 %s1576_s5, 4 }
 0x170   : > { %s717_s7 = ssub.s32 256, %s1002_s6 }
 0x171   : > { %s718_s30 = sshll.u32 %s717_s7, 4 }
 0x172   : > { %719 = vsyncadd %s704_s20, %s718_s30  ;;  %p1498_p13 = scmp.ne.s32.totalorder %s1002_s6, 0  ;;  %s1004_s4 = sshll.u32 %s1263_s16, 8 }
 0x173   : > { %s723_s8 = scalar_lea.hbm %s1555_s3, %s1004_s4  ;;  %s725_s11 = sshll.u32 %s1424_s10, 4  ;;  %s1507_s11 = int_to_ptr.vmem [resolvable:$true] %s725_s11 }
 0x174   : > { %s727_s27 = sshll.u32 %s723_s8, 4  ;;  %s964_s28 = sshll.u32 %s1576_s5, 8  ;;  %s1509_s27 = int_to_ptr.hbm [resolvable:$true] %s727_s27 }
 0x175   : > { %s1130_s29 = sshra.s32 %s1507_s11, 4  ;;  %s1132_s23 = sshrl.u32 %s964_s28, 4  ;;  %s1131_s29 = int_to_ptr.vmem [resolvable:$true] %s1130_s29 }
 0x176   : > { %s1137_s26 = scalar_lea.vmem %s1131_s29, %s1132_s23  ;;  %s1219_s16 = smov [#allocation7]  }
 0x177   : > { %p1138_p11 = scmp.ne.s32.totalorder %s1131_s29, %s1137_s26  ;;  %s1141_s22 = scalar_lea.vmem %s1219_s16, 512 }
 0x178   : > { %p1143_p9 = scmp.lt.s32.totalorder %s1141_s22, %s1137_s26 }
 0x179   : > { %p1139_p2 = pnand %p1138_p11, %p1498_p13 }
 0x17b   : > { %p1140_p5 = pneg %p1139_p2 }
 0x17d   : > { %p1145_p10 = pnand %p1143_p9, %p1140_p5 }
 0x17f   : > { %1148 = shalt.err (!%p1145_p10)
}
 0x180   : > { %s1149_s10 = sshra.s32 %s1509_s27, 4  ;;  %s1160_s4 = scalar_lea.hbm %s1555_s3, 384  ;;  %s1150_s10 = int_to_ptr.hbm [resolvable:$true] %s1149_s10 }
 0x181   : > { %s1156_s6 = scalar_lea.hbm %s1150_s10, %s1132_s23  ;;  %p1161_p7 = scmp.lt.s32.totalorder %s1150_s10, %s1555_s3 }
 0x182   : > { %p1157_p1 = scmp.ne.s32.totalorder %s1150_s10, %s1156_s6  ;;  %p1162_p8 = scmp.lt.s32.totalorder %s1160_s4, %s1156_s6 }
 0x184   : > { %p1158_p0 = pnand %p1157_p1, %p1498_p13  ;;  %p1163_p4 = por %p1162_p8, %p1161_p7 }
 0x186   : > { %p1159_p3 = pneg %p1158_p0 }
 0x188   : > { %p1164_p12 = pnand %p1163_p4, %p1159_p3 }
 0x18a   : > { %1167 = shalt.err (!%p1164_p12)
}
 0x18b   : > { %s1220_s8 = smov 256   ;;  %s1221_s29 = smov 16  }
 0x18c   : > { %733 = dma.vmem_to_hbm [thread:$0]  (%p1498_p13), %s1507_s11, %s964_s28, %s1509_s27, %s704_s20, %s1220_s8, %s1220_s8, %s1221_s29  }
 0x18d PF: > { %s742_s23 = sand.u32 1, %s1199_s12   ;;  %p1567_p6 = scmp.ne.s32.totalorder %s1561_s25, 0 }
 0x18e   : > { %p1568_p11 = scmp.ge.s32.totalorder %s1211_s15, 2  ;;  %s743_s26 = scalar_lea.sflag [#allocation4], %s742_s23 }
 0x190   : > { %p1016_p2 = pnand %p1568_p11, %p1567_p6 }
 0x192   : > { %p1017_p5 = pneg %p1016_p2 }
 0x194   : > { %1194 = dma.done.wait (%p1017_p5), %s743_s26, 4096  }
 0x195   : > { %1196 = vsyncadd (%p1017_p5), %s743_s26, 4294963200  ;;  %p17_p9 = scmp.ge.s32.totalorder %s1267_s18, 4   ;;  %s1569_s12 = smov %s1203_s13 }
 0x196   : > { %s1570_s13 = smov %s1207_s14  ;;  %s1571_s14 = smov %s1279_s21 }
 0x197   : > { %s1572_s15 = smov %s1267_s18  ;;  %19 = sbr.rel (!%p17_p9) target bundleno = 6 (0x6), region = 81 }
 0x19c   :  { %749 = vsyncpa [#allocation3], 1 }
 0x19d   :  { %751 = vsyncpa [#allocation3 + $0x1], 1 }
 0x19e   :  { %752 = vsyncpa [#allocation6], 1 }
 0x19f   :  { %753 = vsyncpa [#allocation4], 1 }
 0x1a0   :  { %755 = vsyncpa [#allocation4 + $0x1], 1 }

</bundles_post_ra>
